<compile_context>
chip_gen: v5e
topology: v5e:2x2
jax: 0.10.0
libtpu: 0.0.40
codegen_flags: <defaults>
</compile_context>

<pallas_src>
import functools

import jax
import jax.numpy as jnp
from jax import lax
from jax.experimental import pallas as pl
from jax.experimental.pallas import tpu as pltpu


def _round_up(x, m):
    return (x + m - 1) // m * m


# ----------------------------------------------------------------------------
# Fused kernel: folded Conv1d + GRU input projection (stage 1, hoisted) and
# the GRU time recurrence (stage 2).  PyTorch gate order (r, z, n).
# ----------------------------------------------------------------------------
def encoder_kernel(patches_ref, wfold_ref, bfold_ref, wh_ref, bh_ref,
                   out_ref, xp_scr):
    Tp, Bp, Hp = out_ref.shape

    # ---- Stage 1: input projection for ALL timesteps (conv folded in) ------
    # (Tp*Bp, LVp) x (LVp, 3*Hp) -> VMEM scratch; off the serial critical path.
    xp_scr[...] = (
        jnp.dot(patches_ref[...], wfold_ref[...],
                preferred_element_type=jnp.float32)
        + bfold_ref[...])

    wh = wh_ref[...]          # (Hp, 3*Hp)   [r | z | n] blocks of width Hp
    bh = bh_ref[...]          # (1, 3*Hp)    [b_hr | b_hz | b_hn]

    # ---- Stage 2: GRU recurrence --------------------------------------------
    #   r = sigmoid(Wir x + b_ir + Whr h + b_hr)
    #   z = sigmoid(Wiz x + b_iz + Whz h + b_hz)
    #   n = tanh   (Win x + b_in + r * (Whn h + b_hn))
    #   h = (1 - z) * n + z * h
    def step(t, h):
        row = pl.multiple_of(t * Bp, Bp)
        xp_t = xp_scr[pl.ds(row, Bp), :]                           # (Bp, 3Hp)
        gh = jnp.dot(h, wh, preferred_element_type=jnp.float32) + bh
        r = jax.nn.sigmoid(xp_t[:, 0 * Hp:1 * Hp] + gh[:, 0 * Hp:1 * Hp])
        z = jax.nn.sigmoid(xp_t[:, 1 * Hp:2 * Hp] + gh[:, 1 * Hp:2 * Hp])
        n = jnp.tanh(xp_t[:, 2 * Hp:3 * Hp] + r * gh[:, 2 * Hp:3 * Hp])
        h_new = (1.0 - z) * n + z * h
        out_ref[t] = h_new.astype(out_ref.dtype)                   # (Bp, Hp)
        return h_new

    lax.fori_loop(0, Tp, step, jnp.zeros((Bp, Hp), jnp.float32))


# ----------------------------------------------------------------------------
# Parameter init (deterministic, synthetic; PyTorch-layout shapes)
# ----------------------------------------------------------------------------
def init_params(key, V, L, F_, H):
    ks = jax.random.split(key, 6)

    def u(k, shape, fan_in):
        s = 1.0 / (fan_in ** 0.5)
        return jax.random.uniform(k, shape, jnp.float32, -s, s)

    return dict(
        conv_w=u(ks[0], (F_, V, L), V * L),     # nn.Conv1d weight (out, in, k)
        conv_b=u(ks[1], (F_,), V * L),
        w_ih=u(ks[2], (3 * H, F_), H),          # nn.GRU weight_ih_l0
        w_hh=u(ks[3], (3 * H, H), H),           # nn.GRU weight_hh_l0
        b_ih=u(ks[4], (3 * H,), H),
        b_hh=u(ks[5], (3 * H,), H),
    )


# ----------------------------------------------------------------------------
# Forward wrapper: im2col + one-time weight packing/folding, then ONE kernel.
# ----------------------------------------------------------------------------
def encoder_forward(speech, params, *, filter_length, stride):
    B, T, V = speech.shape
    L = filter_length
    Tp = (T - L) // stride + 1
    F_ = params["conv_w"].shape[0]
    H = params["w_hh"].shape[1]

    Hp = _round_up(H, 128)          # lane-padded hidden width
    LV = L * V
    LVp = _round_up(LV, 128)        # lane-padded im2col width
    Bp = _round_up(B, 8)            # sublane-padded batch

    # ---- im2col patches, time-major, zero-padded to (Tp*Bp, LVp) ------------
    t_idx = jnp.arange(Tp)[:, None] * stride + jnp.arange(L)[None, :]   # (Tp, L)
    patches = speech[:, t_idx, :]                                       # (B,Tp,L,V)
    patches = jnp.transpose(patches, (1, 0, 2, 3)).reshape(Tp, B, LV)
    patches = jnp.pad(patches, ((0, 0), (0, Bp - B), (0, LVp - LV)))
    patches = patches.reshape(Tp * Bp, LVp)

    # ---- one-time weight prep: per-gate packing + Conv1d fold ---------------
    w_conv = jnp.transpose(params["conv_w"], (2, 1, 0)).reshape(LV, F_)  # (LV,F)
    b_conv = params["conv_b"].reshape(1, F_)
    w_ih, w_hh = params["w_ih"], params["w_hh"]
    b_ih, b_hh = params["b_ih"], params["b_hh"]

    def pack_gates(w_g, b_g, rows, rows_pad):
        # w_g: (3H, rows) PyTorch layout -> (rows_pad, 3*Hp), bias -> (1, 3*Hp)
        w = jnp.zeros((rows_pad, 3 * Hp), jnp.float32)
        b = jnp.zeros((1, 3 * Hp), jnp.float32)
        for g in range(3):
            w = w.at[:rows, g * Hp:g * Hp + H].set(w_g[g * H:(g + 1) * H].T)
            b = b.at[:, g * Hp:g * Hp + H].set(b_g[g * H:(g + 1) * H][None, :])
        return w, b

    w_i3, b_i3 = pack_gates(w_ih, b_ih, F_, F_)          # (F, 3Hp), (1, 3Hp)
    w_h3, b_h3 = pack_gates(w_hh, b_hh, H, Hp)           # (Hp, 3Hp), (1, 3Hp)

    # Fold the (activation-free) Conv1d into the GRU input projection:
    #   xp = conv_out @ Wi3 + bi3 = patches @ (Wc @ Wi3) + (bc @ Wi3 + bi3)
    w_fold = jnp.zeros((LVp, 3 * Hp), jnp.float32).at[:LV].set(w_conv @ w_i3)
    b_fold = b_conv @ w_i3 + b_i3                        # (1, 3Hp)

    # TODO(synk): at production sizes (large Tp*B), row-tile stage 1 with a
    # "parallel" grid axis and an explicit vmem_limit_bytes budget (64 MiB on
    # v7x); at these toy shapes everything fits in a single VMEM block.
    vmem = pl.BlockSpec(memory_space=pltpu.MemorySpace.VMEM)
    out = pl.pallas_call(
        encoder_kernel,
        out_shape=jax.ShapeDtypeStruct((Tp, Bp, Hp), jnp.float32),
        in_specs=[vmem] * 5,
        out_specs=vmem,
        scratch_shapes=[pltpu.VMEM((Tp * Bp, 3 * Hp), jnp.float32)],
    )(patches, w_fold, b_fold, w_h3, b_h3)

    # batch_first output of the (depth=1, residual no-op) StackedGRU
    return jnp.transpose(out, (1, 0, 2))[:B, :, :H]      # (B, Tp, H)


if __name__ == "__main__":
    # Small config consistent with Encoder defaults (filter_length=6, stride=2).
    B, T, V = 2, 20, 13          # batch, speech frames, size_vocab
    L, STRIDE = 6, 2             # filter_length, stride
    F_, H = 64, 32               # filter_size, size (hidden)

    key = jax.random.PRNGKey(0)
    k_in, k_par = jax.random.split(key)
    speech = jax.random.normal(k_in, (B, T, V), jnp.float32)
    params = init_params(k_par, V, L, F_, H)

    fwd = jax.jit(functools.partial(encoder_forward,
                                    filter_length=L, stride=STRIDE))
    out = jax.block_until_ready(fwd(speech, params))

    Tp = (T - L) // STRIDE + 1
    assert out.shape == (B, Tp, H)
    assert bool(jnp.all(jnp.isfinite(out)))
    print("KERNEL_OK")
</pallas_src>

<mosaic_0001>
module attributes {stable_mosaic.version = 11 : i64} {
  func.func @encoder_kernel(%arg0: memref<64x128xf32, #tpu.memory_space<vmem>>, %arg1: memref<128x384xf32, #tpu.memory_space<vmem>>, %arg2: memref<1x384xf32, #tpu.memory_space<vmem>>, %arg3: memref<128x384xf32, #tpu.memory_space<vmem>>, %arg4: memref<1x384xf32, #tpu.memory_space<vmem>>, %arg5: memref<8x8x128xf32, #tpu.memory_space<vmem>>, %arg6: memref<64x384xf32, #tpu.memory_space<vmem>>) attributes {dimension_semantics = [], scalar_prefetch = 0 : i64, scratch_operands = 1 : i64, tpu.core_type = #tpu.core_type<tc>} {
    %c0 = arith.constant 0 : index
    %c0_0 = arith.constant 0 : index
    %0 = vector.load %arg0[%c0, %c0_0] : memref<64x128xf32, #tpu.memory_space<vmem>>, vector<64x128xf32>
    %c0_1 = arith.constant 0 : index
    %c0_2 = arith.constant 0 : index
    %1 = vector.load %arg1[%c0_1, %c0_2] : memref<128x384xf32, #tpu.memory_space<vmem>>, vector<128x384xf32>
    %cst = arith.constant dense<0.000000e+00> : vector<64x384xf32>
    %2 = tpu.matmul %0, %1, %cst {dimension_numbers = #tpu.dot_dimension_numbers<[1], [0], [0], [1], [0, 0, 1, 1], [], []>} : vector<64x128xf32>, vector<128x384xf32>, vector<64x384xf32> -> vector<64x384xf32>
    %c0_3 = arith.constant 0 : index
    %c0_4 = arith.constant 0 : index
    %3 = vector.load %arg2[%c0_3, %c0_4] : memref<1x384xf32, #tpu.memory_space<vmem>>, vector<1x384xf32>
    %4 = vector.broadcast %3 : vector<1x384xf32> to vector<64x384xf32>
    %5 = arith.addf %2, %4 : vector<64x384xf32>
    %c0_5 = arith.constant 0 : index
    %c0_6 = arith.constant 0 : index
    %6 = vector.load %arg6[%c0_5, %c0_6] : memref<64x384xf32, #tpu.memory_space<vmem>>, vector<64x384xf32>
    tpu.vector_store %arg6[%c0_5, %c0_6], %5 {strides = array<i32>} : memref<64x384xf32, #tpu.memory_space<vmem>>, vector<64x384xf32>,
    %c0_7 = arith.constant 0 : index
    %c0_8 = arith.constant 0 : index
    %7 = vector.load %arg3[%c0_7, %c0_8] : memref<128x384xf32, #tpu.memory_space<vmem>>, vector<128x384xf32>
    %c0_9 = arith.constant 0 : index
    %c0_10 = arith.constant 0 : index
    %8 = vector.load %arg4[%c0_9, %c0_10] : memref<1x384xf32, #tpu.memory_space<vmem>>, vector<1x384xf32>
    %cst_11 = arith.constant 0.000000e+00 : f32
    %9 = vector.broadcast %cst_11 : f32 to vector<8x128xf32>
    %c0_i32 = arith.constant 0 : i32
    %c8_i32 = arith.constant 8 : i32
    %10 = arith.addi %c0_i32, %c8_i32 : i32
    %c1_i32 = arith.constant 1 : i32
    %11 = scf.for %arg7 = %c0_i32 to %10 step %c1_i32 iter_args(%arg8 = %9) -> (vector<8x128xf32>)  : i32 {
      %c8_i32_13 = arith.constant 8 : i32
      %12 = arith.muli %arg7, %c8_i32_13 : i32
      %13 = tpu.assume_multiple %12, 8 : i32
      %14 = arith.index_cast %13 : i32 to index
      %c0_14 = arith.constant 0 : index
      %15 = vector.load %arg6[%14, %c0_14] : memref<64x384xf32, #tpu.memory_space<vmem>>, vector<8x384xf32>
      %cst_15 = arith.constant dense<0.000000e+00> : vector<8x384xf32>
      %16 = tpu.matmul %arg8, %7, %cst_15 {dimension_numbers = #tpu.dot_dimension_numbers<[1], [0], [0], [1], [0, 0, 1, 1], [], []>} : vector<8x128xf32>, vector<128x384xf32>, vector<8x384xf32> -> vector<8x384xf32>
      %17 = vector.broadcast %8 : vector<1x384xf32> to vector<8x384xf32>
      %18 = arith.addf %16, %17 : vector<8x384xf32>
      %19 = vector.extract_strided_slice %15 {offsets = [0, 0], sizes = [8, 128], strides = [1, 1]} : vector<8x384xf32> to vector<8x128xf32>
      %20 = vector.extract_strided_slice %18 {offsets = [0, 0], sizes = [8, 128], strides = [1, 1]} : vector<8x384xf32> to vector<8x128xf32>
      %21 = arith.addf %19, %20 : vector<8x128xf32>
      %22 = arith.negf %21 : vector<8x128xf32>
      %23 = math.exp %22 : vector<8x128xf32>
      %cst_16 = arith.constant 1.000000e+00 : f32
      %24 = vector.broadcast %cst_16 : f32 to vector<8x128xf32>
      %25 = arith.addf %24, %23 : vector<8x128xf32>
      %26 = arith.divf %24, %25 : vector<8x128xf32>
      %27 = vector.extract_strided_slice %15 {offsets = [0, 128], sizes = [8, 128], strides = [1, 1]} : vector<8x384xf32> to vector<8x128xf32>
      %28 = vector.extract_strided_slice %18 {offsets = [0, 128], sizes = [8, 128], strides = [1, 1]} : vector<8x384xf32> to vector<8x128xf32>
      %29 = arith.addf %27, %28 : vector<8x128xf32>
      %30 = arith.negf %29 : vector<8x128xf32>
      %31 = math.exp %30 : vector<8x128xf32>
      %cst_17 = arith.constant 1.000000e+00 : f32
      %32 = vector.broadcast %cst_17 : f32 to vector<8x128xf32>
      %33 = arith.addf %32, %31 : vector<8x128xf32>
      %34 = arith.divf %32, %33 : vector<8x128xf32>
      %35 = vector.extract_strided_slice %15 {offsets = [0, 256], sizes = [8, 128], strides = [1, 1]} : vector<8x384xf32> to vector<8x128xf32>
      %36 = vector.extract_strided_slice %18 {offsets = [0, 256], sizes = [8, 128], strides = [1, 1]} : vector<8x384xf32> to vector<8x128xf32>
      %37 = arith.mulf %26, %36 : vector<8x128xf32>
      %38 = arith.addf %35, %37 : vector<8x128xf32>
      %39 = math.tanh %38 : vector<8x128xf32>
      %cst_18 = arith.constant 1.000000e+00 : f32
      %40 = vector.broadcast %cst_18 : f32 to vector<8x128xf32>
      %41 = arith.subf %40, %34 : vector<8x128xf32>
      %42 = arith.mulf %41, %39 : vector<8x128xf32>
      %43 = arith.mulf %34, %arg8 : vector<8x128xf32>
      %44 = arith.addf %42, %43 : vector<8x128xf32>
      %45 = arith.index_cast %arg7 : i32 to index
      %c0_19 = arith.constant 0 : index
      %c0_20 = arith.constant 0 : index
      %46 = vector.load %arg5[%45, %c0_19, %c0_20] : memref<8x8x128xf32, #tpu.memory_space<vmem>>, vector<1x8x128xf32>
      %47 = vector.shape_cast %46 : vector<1x8x128xf32> to vector<8x128xf32>
      %48 = vector.shape_cast %44 : vector<8x128xf32> to vector<1x8x128xf32>
      tpu.vector_store %arg5[%45, %c0_19, %c0_20], %48 {strides = array<i32>} : memref<8x8x128xf32, #tpu.memory_space<vmem>>, vector<1x8x128xf32>,
      scf.yield %44 : vector<8x128xf32>
    }
    %c8_i32_12 = arith.constant 8 : i32
    return
  }
}

</mosaic_0001>

<bundles_post_ra>
// kernel: encoder_forward.1
= control target key start
LH: loop header
LB: loop body
LE: loop exit
PB: predicated region body
PF: predicated region fallthrough
CT: control target
= control target key end

     0   :  { %s1118_s1 = inlined_call_operand.vmem [shape: f32[128,384], index: 1, kind: input, shape index: {}]   ;;  %s1119_s5 = inlined_call_operand.vmem [shape: f32[8,8,128], index: 5, kind: output, shape index: {}]   ;;  %s1120_s0 = inlined_call_operand.vmem [shape: f32[64,128], index: 0, kind: input, shape index: {}]   ;;  %s1121_s2 = inlined_call_operand.vmem [shape: f32[1,384], index: 2, kind: input, shape index: {}]   ;;  %s1122_s3 = inlined_call_operand.vmem [shape: f32[128,384], index: 3, kind: input, shape index: {}]   ;;  %s1123_s4 = inlined_call_operand.vmem [shape: f32[1,384], index: 4, kind: input, shape index: {}]  }
   0x1   :  { %v75_v0 = vld [vmem:[%s1118_s1 + $0x178] sm:$0xff]  ;;  %v72_v1 = vld [vmem:[%s1118_s1 + $0x160] sm:$0xff]  ;;  %v69_v2 = vld [vmem:[%s1118_s1 + $0x148] sm:$0xff] }
   0x2   :  { %166 = vmatpush.msra.mxu2 %v75_v0  ;;  %v549_v3 = vld [vmem:[%s1118_s1 + $0x170] sm:$0xff]  ;;  %v555_v4 = vld [vmem:[%s1118_s1 + $0x158] sm:$0xff]  ;;  %v563_v6 = vld [vmem:[%s1118_s1 + $0x140] sm:$0xff] }
   0x3   :  { %125 = vmatpush.msra.mxu1 %v549_v3  ;;  %v66_v5 = vld [vmem:[%s1118_s1 + $0x130] sm:$0xff]  ;;  %v73_v7 = vld [vmem:[%s1118_s1 + $0x168] sm:$0xff]  ;;  %v63_v8 = vld [vmem:[%s1118_s1 + $0x118] sm:$0xff] }
   0x4   :  { %167 = vmatpush.msra.mxu2 %v72_v1  ;;  %v575_v9 = vld [vmem:[%s1118_s1 + $0x128] sm:$0xff]  ;;  %84 = vmatpush.msra.mxu0 %v73_v7  ;;  %v70_v10 = vld [vmem:[%s1118_s1 + $0x150] sm:$0xff]  ;;  %v67_v11 = vld [vmem:[%s1118_s1 + $0x138] sm:$0xff] }
   0x5   :  { %126 = vmatpush.msra.mxu1 %v555_v4  ;;  %433 = vmatpush.msra.mxu3 %v73_v7  ;;  %v60_v12 = vld [vmem:[%s1118_s1 + $0x100] sm:$0xff]  ;;  %v590_v13 = vld [vmem:[%s1118_s1 + $0x110] sm:$0xff]  ;;  %v57_v15 = vld [vmem:[%s1118_s1 + $0xe8] sm:$0xff] }
   0x6   :  { %168 = vmatpush.msra.mxu2 %v69_v2  ;;  %85 = vmatpush.msra.mxu0 %v70_v10  ;;  %v64_v14 = vld [vmem:[%s1118_s1 + $0x120] sm:$0xff]  ;;  %v602_v16 = vld [vmem:[%s1118_s1 + $0xf8] sm:$0xff]  ;;  %v61_v17 = vld [vmem:[%s1118_s1 + $0x108] sm:$0xff] }
   0x7   :  { %127 = vmatpush.msra.mxu1 %v563_v6  ;;  %434 = vmatpush.msra.mxu3 %v70_v10  ;;  %v54_v18 = vld [vmem:[%s1118_s1 + $0xd0] sm:$0xff]  ;;  %v614_v19 = vld [vmem:[%s1118_s1 + $0xe0] sm:$0xff]  ;;  %v51_v21 = vld [vmem:[%s1118_s1 + $0xb8] sm:$0xff] }
   0x8   :  { %169 = vmatpush.msra.mxu2 %v66_v5  ;;  %86 = vmatpush.msra.mxu0 %v67_v11  ;;  %v58_v20 = vld [vmem:[%s1118_s1 + $0xf0] sm:$0xff]  ;;  %v626_v22 = vld [vmem:[%s1118_s1 + $0xc8] sm:$0xff]  ;;  %v55_v23 = vld [vmem:[%s1118_s1 + $0xd8] sm:$0xff] }
   0x9   :  { %128 = vmatpush.msra.mxu1 %v575_v9  ;;  %435 = vmatpush.msra.mxu3 %v67_v11  ;;  %v48_v24 = vld [vmem:[%s1118_s1 + $0xa0] sm:$0xff]  ;;  %v638_v25 = vld [vmem:[%s1118_s1 + $0xb0] sm:$0xff]  ;;  %v45_v27 = vld [vmem:[%s1118_s1 + $0x88] sm:$0xff] }
   0xa   :  { %170 = vmatpush.msra.mxu2 %v63_v8  ;;  %87 = vmatpush.msra.mxu0 %v64_v14  ;;  %v52_v26 = vld [vmem:[%s1118_s1 + $0xc0] sm:$0xff]  ;;  %v650_v28 = vld [vmem:[%s1118_s1 + $0x98] sm:$0xff]  ;;  %v49_v29 = vld [vmem:[%s1118_s1 + $0xa8] sm:$0xff] }
   0xb   :  { %129 = vmatpush.msra.mxu1 %v590_v13  ;;  %436 = vmatpush.msra.mxu3 %v64_v14  ;;  %v42_v30 = vld [vmem:[%s1118_s1 + $0x70] sm:$0xff]  ;;  %v662_v31 = vld [vmem:[%s1118_s1 + $0x80] sm:$0xff]  ;;  %v39_v33 = vld [vmem:[%s1118_s1 + $0x58] sm:$0xff] }
   0xc   :  { %171 = vmatpush.msra.mxu2 %v60_v12  ;;  %88 = vmatpush.msra.mxu0 %v61_v17  ;;  %v46_v32 = vld [vmem:[%s1118_s1 + $0x90] sm:$0xff]  ;;  %v674_v34 = vld [vmem:[%s1118_s1 + $0x68] sm:$0xff]  ;;  %v43_v35 = vld [vmem:[%s1118_s1 + $0x78] sm:$0xff] }
   0xd   :  { %130 = vmatpush.msra.mxu1 %v602_v16  ;;  %437 = vmatpush.msra.mxu3 %v61_v17  ;;  %v36_v36 = vld [vmem:[%s1118_s1 + $0x40] sm:$0xff]  ;;  %v686_v37 = vld [vmem:[%s1118_s1 + $0x50] sm:$0xff]  ;;  %v33_v39 = vld [vmem:[%s1118_s1 + $0x28] sm:$0xff] }
   0xe   :  { %172 = vmatpush.msra.mxu2 %v57_v15  ;;  %89 = vmatpush.msra.mxu0 %v58_v20  ;;  %v40_v38 = vld [vmem:[%s1118_s1 + $0x60] sm:$0xff]  ;;  %v35_v40 = vld [vmem:[%s1118_s1 + $0x38] sm:$0xff]  ;;  %v37_v41 = vld [vmem:[%s1118_s1 + $0x48] sm:$0xff] }
   0xf   :  { %131 = vmatpush.msra.mxu1 %v614_v19  ;;  %438 = vmatpush.msra.mxu3 %v58_v20  ;;  %v30_v42 = vld [vmem:[%s1118_s1 + $0x10] sm:$0xff]  ;;  %v32_v43 = vld [vmem:[%s1118_s1 + $0x20] sm:$0xff]  ;;  %v29_v46 = vld [vmem:[%s1118_s1 + $0x8] sm:$0xff] }
  0x10   :  { %173 = vmatpush.msra.mxu2 %v54_v18  ;;  %90 = vmatpush.msra.mxu0 %v55_v23  ;;  %v20_v44 = vld [vmem:[%s1120_s0] sm:$0xff]  ;;  %v34_v45 = vld [vmem:[%s1118_s1 + $0x30] sm:$0xff]  ;;  %v31_v47 = vld [vmem:[%s1118_s1 + $0x18] sm:$0xff] }
  0x11   :  { %132 = vmatpush.msra.mxu1 %v626_v22  ;;  %439 = vmatpush.msra.mxu3 %v55_v23  ;;  %v28_v48 = vld [vmem:[%s1118_s1] sm:$0xff]  ;;  %v26_v49 = vld [vmem:[%s1120_s0 + $0x30] sm:$0xff]  ;;  %v21_v50 = vld [vmem:[%s1120_s0 + $0x8] sm:$0xff] }
  0x12   :  { %174 = vmatpush.msra.mxu2 %v51_v21  ;;  %91 = vmatpush.msra.mxu0 %v52_v26  ;;  %v27_v51 = vld [vmem:[%s1120_s0 + $0x38] sm:$0xff]  ;;  %v22_v52 = vld [vmem:[%s1120_s0 + $0x10] sm:$0xff]  ;;  %v24_v54 = vld [vmem:[%s1120_s0 + $0x20] sm:$0xff] }
  0x13   :  { %133 = vmatpush.msra.mxu1 %v638_v25  ;;  %440 = vmatpush.msra.mxu3 %v52_v26  ;;  %v23_v53 = vld [vmem:[%s1120_s0 + $0x18] sm:$0xff]  ;;  %v25_v55 = vld [vmem:[%s1120_s0 + $0x28] sm:$0xff]  ;;  %v76_v56 = vld [vmem:[%s1121_s2] sm:$0x7] }
  0x14   :  { %175 = vmatpush.msra.mxu2 %v48_v24  ;;  %92 = vmatpush.msra.mxu0 %v49_v29  ;;  %v760_v57 = vperm.slane %v76_v56, 1  ;;  %v762_v59 = vperm.slane %v76_v56, 0  ;;  %v764_v60 = vperm.slane %v76_v56, 2  ;;  %v783_v24 = vld [vmem:[%s1122_s3] sm:$0xff]  ;;  %v793_v26 = vld [vmem:[%s1122_s3 + $0x10] sm:$0xff] }
  0x15   :  { %134 = vmatpush.msra.mxu1 %v650_v28  ;;  %441 = vmatpush.msra.mxu3 %v49_v29  ;;  %v803_v29 = vld [vmem:[%s1122_s3 + $0x20] sm:$0xff]  ;;  %v916_v56 = vld [vmem:[%s1122_s3 + $0xd0] sm:$0xff] }
  0x16   :  { %176 = vmatpush.msra.mxu2 %v45_v27  ;;  %93 = vmatpush.msra.mxu0 %v46_v32 }
  0x17   :  { %135 = vmatpush.msra.mxu1 %v662_v31  ;;  %442 = vmatpush.msra.mxu3 %v46_v32  ;;  %v814_v32 = vld [vmem:[%s1122_s3 + $0x30] sm:$0xff] }
  0x18   :  { %177 = vmatpush.msra.mxu2 %v42_v30  ;;  %94 = vmatpush.msra.mxu0 %v43_v35  ;;  %v808_v30 = vld [vmem:[%s1122_s3 + $0x28] sm:$0xff] }
  0x19   :  { %136 = vmatpush.msra.mxu1 %v674_v34  ;;  %443 = vmatpush.msra.mxu3 %v43_v35  ;;  %v829_v35 = vld [vmem:[%s1122_s3 + $0x48] sm:$0xff] }
  0x1a   :  { %178 = vmatpush.msra.mxu2 %v39_v33  ;;  %95 = vmatpush.msra.mxu0 %v40_v38  ;;  %v819_v33 = vld [vmem:[%s1122_s3 + $0x38] sm:$0xff] }
  0x1b   :  { %137 = vmatpush.msra.mxu1 %v686_v37  ;;  %444 = vmatpush.msra.mxu3 %v40_v38 }
  0x1c   :  { %179 = vmatpush.msra.mxu2 %v36_v36  ;;  %96 = vmatpush.msra.mxu0 %v37_v41  ;;  %v834_v36 = vld [vmem:[%s1122_s3 + $0x50] sm:$0xff] }
  0x1d   :  { %138 = vmatpush.msra.mxu1 %v35_v40  ;;  %445 = vmatpush.msra.mxu3 %v37_v41  ;;  %v854_v41 = vld [vmem:[%s1122_s3 + $0x70] sm:$0xff] }
  0x1e   :  { %180 = vmatpush.msra.mxu2 %v33_v39  ;;  %97 = vmatpush.msra.mxu0 %v34_v45  ;;  %v844_v39 = vld [vmem:[%s1122_s3 + $0x60] sm:$0xff] }
  0x1f   :  { %139 = vmatpush.msra.mxu1 %v32_v43  ;;  %446 = vmatpush.msra.mxu3 %v34_v45  ;;  %v865_v45 = vld [vmem:[%s1122_s3 + $0x80] sm:$0xff] }
  0x20   :  { %181 = vmatpush.msra.mxu2 %v30_v42  ;;  %98 = vmatpush.msra.mxu0 %v31_v47 }
  0x21   :  { %182 = vmatmul.f32.vlgmr.msra.gmra.mxu2 %v20_v44  ;;  %140 = vmatpush.msra.mxu1 %v29_v46 }
  0x22   :  { %141 = vmatmul.f32.vlgmr.msra.gmra.mxu1 %v20_v44  ;;  %447 = vmatpush.msra.mxu3 %v31_v47 }
  0x23   :  { %99 = vmatpush.msra.mxu0 %v28_v48 }
  0x24   :  { %100 = vmatmul.f32.vlgmr.msra.gmra.mxu0 %v20_v44  ;;  %448 = vmatpush.msra.mxu3 %v28_v48  ;;  %v860_v44 = vld [vmem:[%s1122_s3 + $0x78] sm:$0xff]  ;;  %v876_v48 = vld [vmem:[%s1122_s3 + $0x90] sm:$0xff] }
  0x25   :  { %118 = vmatmul.f32.vlgmr.msra.gmra.mxu3 %v26_v49 }
  0x26   :  { %449 = vmatpush.msrb.mxu3 %v549_v3 }
  0x28   :  { %450 = vmatpush.msrb.mxu3 %v555_v4 }
  0x29   :  { %185 = vmatmul.f32.gmra.mxu2 %v21_v50 }
  0x2a   :  { %144 = vmatmul.f32.gmra.mxu1 %v21_v50  ;;  %451 = vmatpush.msrb.mxu3 %v563_v6 }
  0x2c   :  { %452 = vmatpush.msrb.mxu3 %v575_v9  ;;  %103 = vmatmul.f32.gmra.mxu0 %v21_v50  ;;  %v886_v50 = vld [vmem:[%s1122_s3 + $0xa0] sm:$0xff] }
  0x2d   :  { %121 = vmatmul.f32.gmra.mxu3 %v27_v51 }
  0x2e   :  { %453 = vmatpush.msrb.mxu3 %v590_v13 }
  0x30   :  { %454 = vmatpush.msrb.mxu3 %v602_v16 }
  0x31   :  { %188 = vmatmul.f32.gmra.mxu2 %v22_v52 }
  0x32   :  { %147 = vmatmul.f32.gmra.mxu1 %v22_v52  ;;  %455 = vmatpush.msrb.mxu3 %v614_v19 }
  0x34   :  { %456 = vmatpush.msrb.mxu3 %v626_v22  ;;  %106 = vmatmul.f32.gmra.mxu0 %v22_v52  ;;  %v896_v52 = vld [vmem:[%s1122_s3 + $0xb0] sm:$0xff] }
  0x36   :  { %457 = vmatpush.msrb.mxu3 %v638_v25  ;;  %v788_v25 = vld [vmem:[%s1122_s3 + $0x8] sm:$0xff] }
  0x38   :  { %458 = vmatpush.msrb.mxu3 %v650_v28  ;;  %v798_v28 = vld [vmem:[%s1122_s3 + $0x18] sm:$0xff] }
  0x39   :  { %191 = vmatmul.f32.gmra.mxu2 %v23_v53 }
  0x3a   :  { %150 = vmatmul.f32.gmra.mxu1 %v23_v53  ;;  %459 = vmatpush.msrb.mxu3 %v662_v31 }
  0x3c   :  { %460 = vmatpush.msrb.mxu3 %v674_v34  ;;  %109 = vmatmul.f32.gmra.mxu0 %v23_v53  ;;  %v824_v34 = vld [vmem:[%s1122_s3 + $0x40] sm:$0xff]  ;;  %v901_v53 = vld [vmem:[%s1122_s3 + $0xb8] sm:$0xff] }
  0x3e   :  { %461 = vmatpush.msrb.mxu3 %v686_v37  ;;  %v839_v37 = vld [vmem:[%s1122_s3 + $0x58] sm:$0xff] }
  0x40   :  { %462 = vmatpush.msrb.mxu3 %v35_v40  ;;  %v849_v40 = vld [vmem:[%s1122_s3 + $0x68] sm:$0xff] }
  0x41   :  { %194 = vmatmul.f32.gmra.mxu2 %v24_v54 }
  0x42   :  { %153 = vmatmul.f32.gmra.mxu1 %v24_v54  ;;  %463 = vmatpush.msrb.mxu3 %v32_v43 }
  0x44   :  { %464 = vmatpush.msrb.mxu3 %v29_v46  ;;  %112 = vmatmul.f32.gmra.mxu0 %v24_v54  ;;  %v870_v46 = vld [vmem:[%s1122_s3 + $0x88] sm:$0xff]  ;;  %v906_v54 = vld [vmem:[%s1122_s3 + $0xc0] sm:$0xff] }
  0x45   :  { %162 = vmatmul.f32.vlgmr.msrb.gmra.mxu3 %v27_v51 }
  0x49   :  { %197 = vmatmul.f32.gmra.mxu2 %v25_v55 }
  0x4a   :  { %156 = vmatmul.f32.gmra.mxu1 %v25_v55 }
  0x4c   :  { %115 = vmatmul.f32.gmra.mxu0 %v25_v55  ;;  %v911_v55 = vld [vmem:[%s1122_s3 + $0xc8] sm:$0xff] }
  0x51   :  { %200 = vmatmul.f32.gmra.mxu2 %v26_v49 }
  0x52   :  { %159 = vmatmul.f32.gmra.mxu1 %v26_v49  ;;  %v881_v49 = vld [vmem:[%s1122_s3 + $0x98] sm:$0xff] }
  0x59   :  { %203 = vmatmul.f32.gmra.mxu2 %v27_v51  ;;  %v891_v51 = vld [vmem:[%s1122_s3 + $0xa8] sm:$0xff] }
  0x9f   :  { %v142_v58 = vpop.f32.mrf.mxu1 }
  0xa0   :  { %v143_v61 = vadd.f32 %v142_v58, %v760_v57 }
  0xa1   :  { %v101_v62 = vpop.f32.mrf.mxu0 }
  0xa2   :  { %208 = vst [vmem:[#allocation2 + $0x8] sm:$0xff] %v143_v61  ;;  %v102_v0 = vadd.f32 %v101_v62, %v762_v59  ;;  %v921_v61 = vld [vmem:[%s1122_s3 + $0xd8] sm:$0xff]  ;;  %v926_v62 = vld [vmem:[%s1122_s3 + $0xe0] sm:$0xff] }
  0xa4   :  { %v183_v63 = vpop.f32.mrf.mxu2  ;;  %207 = vst [vmem:[#allocation2] sm:$0xff] %v102_v0 }
  0xa5   :  { %v184_v1 = vadd.f32 %v183_v63, %v764_v60  ;;  %v931_v63 = vld [vmem:[%s1122_s3 + $0xe8] sm:$0xff] }
  0xa7   :  { %209 = vst [vmem:[#allocation2 + $0x10] sm:$0xff] %v184_v1  ;;  %v145_v2 = vpop.f32.mrf.mxu1 }
  0xa8   :  { %v146_v3 = vadd.f32 %v145_v2, %v760_v57  ;;  %v119_v5 = vpop.f32.mrf.mxu3  ;;  %v937_v2 = vld [vmem:[%s1122_s3 + $0xf0] sm:$0xff] }
  0xa9   :  { %v104_v4 = vpop.f32.mrf.mxu0  ;;  %v120_v8 = vadd.f32 %v119_v5, %v762_v59  ;;  %1124 = vst [vmem:[#allocation3_spill] sm:$0xff] %v937_v2 }
  0xaa   :  { %211 = vst [vmem:[#allocation2 + $0x20] sm:$0xff] %v146_v3  ;;  %v105_v7 = vadd.f32 %v104_v4, %v762_v59  ;;  %v942_v3 = vld [vmem:[%s1122_s3 + $0xf8] sm:$0xff]  ;;  %v947_v4 = vld [vmem:[%s1122_s3 + $0x100] sm:$0xff] }
  0xab   :  { %225 = vst [vmem:[#allocation2 + $0x90] sm:$0xff] %v120_v8  ;;  %v963_v8 = vld [vmem:[%s1122_s3 + $0x118] sm:$0xff] }
  0xac   :  { %v186_v6 = vpop.f32.mrf.mxu2  ;;  %210 = vst [vmem:[#allocation2 + $0x18] sm:$0xff] %v105_v7  ;;  %v958_v7 = vld [vmem:[%s1122_s3 + $0x110] sm:$0xff] }
  0xad   :  { %v187_v9 = vadd.f32 %v186_v6, %v764_v60  ;;  %1125 = vst [vmem:[#allocation4_spill] sm:$0xff] %v942_v3  ;;  %v953_v6 = vld [vmem:[%s1122_s3 + $0x108] sm:$0xff] }
  0xae   :  { %1126 = vst [vmem:[#allocation5_spill] sm:$0xff] %v947_v4 }
  0xaf   :  { %212 = vst [vmem:[#allocation2 + $0x28] sm:$0xff] %v187_v9  ;;  %v148_v10 = vpop.f32.mrf.mxu1 }
  0xb0   :  { %v149_v11 = vadd.f32 %v148_v10, %v760_v57  ;;  %v122_v13 = vpop.f32.mrf.mxu3  ;;  %1127 = vst [vmem:[#allocation6_spill] sm:$0xff] %v953_v6  ;;  %v968_v10 = vld [vmem:[%s1122_s3 + $0x120] sm:$0xff] }
  0xb1   :  { %v107_v12 = vpop.f32.mrf.mxu0  ;;  %v123_v16 = vadd.f32 %v122_v13, %v762_v59  ;;  %1128 = vst [vmem:[#allocation7_spill] sm:$0xff] %v958_v7 }
  0xb2   :  { %214 = vst [vmem:[#allocation2 + $0x38] sm:$0xff] %v149_v11  ;;  %v108_v15 = vadd.f32 %v107_v12, %v762_v59  ;;  %v973_v11 = vld [vmem:[%s1122_s3 + $0x128] sm:$0xff]  ;;  %v978_v12 = vld [vmem:[%s1122_s3 + $0x130] sm:$0xff] }
  0xb3   :  { %228 = vst [vmem:[#allocation2 + $0xa8] sm:$0xff] %v123_v16  ;;  %v989_v16 = vld [vmem:[%s1122_s3 + $0x140] sm:$0xff] }
  0xb4   :  { %v189_v14 = vpop.f32.mrf.mxu2  ;;  %213 = vst [vmem:[#allocation2 + $0x30] sm:$0xff] %v108_v15  ;;  %v984_v15 = vld [vmem:[%s1122_s3 + $0x138] sm:$0xff] }
  0xb5   :  { %v190_v17 = vadd.f32 %v189_v14, %v764_v60  ;;  %1129 = vst [vmem:[#allocation8_spill] sm:$0xff] %v963_v8 }
  0xb6   :  { %1130 = vst [vmem:[#allocation9_spill] sm:$0xff] %v968_v10 }
  0xb7   :  { %215 = vst [vmem:[#allocation2 + $0x40] sm:$0xff] %v190_v17  ;;  %v151_v18 = vpop.f32.mrf.mxu1  ;;  %v994_v17 = vld [vmem:[%s1122_s3 + $0x148] sm:$0xff] }
  0xb8   :  { %v152_v19 = vadd.f32 %v151_v18, %v760_v57  ;;  %1131 = vst [vmem:[#allocation10_spill] sm:$0xff] %v973_v11 }
  0xb9   :  { %v110_v20 = vpop.f32.mrf.mxu0  ;;  %1132 = vst [vmem:[#allocation11_spill] sm:$0xff] %v978_v12 }
  0xba   :  { %217 = vst [vmem:[#allocation2 + $0x50] sm:$0xff] %v152_v19  ;;  %v111_v22 = vadd.f32 %v110_v20, %v762_v59  ;;  %v1005_v19 = vld [vmem:[%s1122_s3 + $0x158] sm:$0xff]  ;;  %v1010_v20 = vld [vmem:[%s1122_s3 + $0x160] sm:$0xff] }
  0xbc   :  { %v192_v21 = vpop.f32.mrf.mxu2  ;;  %216 = vst [vmem:[#allocation2 + $0x48] sm:$0xff] %v111_v22  ;;  %v1020_v22 = vld [vmem:[%s1122_s3 + $0x170] sm:$0xff] }
  0xbd   :  { %v193_v23 = vadd.f32 %v192_v21, %v764_v60  ;;  %v1015_v21 = vld [vmem:[%s1122_s3 + $0x168] sm:$0xff] }
  0xbf   :  { %218 = vst [vmem:[#allocation2 + $0x58] sm:$0xff] %v193_v23  ;;  %v154_v27 = vpop.f32.mrf.mxu1  ;;  %v1025_v23 = vld [vmem:[%s1122_s3 + $0x178] sm:$0xff] }
  0xc0   :  { %v155_v31 = vadd.f32 %v154_v27, %v760_v57  ;;  %v1030_v27 = vld [vmem:[%s1123_s4] sm:$0x7] }
  0xc1   :  { %v113_v38 = vpop.f32.mrf.mxu0 }
  0xc2   :  { %220 = vst [vmem:[#allocation2 + $0x68] sm:$0xff] %v155_v31  ;;  %v114_v43 = vadd.f32 %v113_v38, %v762_v59 }
  0xc4   :  { %v195_v42 = vpop.f32.mrf.mxu2  ;;  %219 = vst [vmem:[#allocation2 + $0x60] sm:$0xff] %v114_v43 }
  0xc5   :  { %v196_v47 = vadd.f32 %v195_v42, %v764_v60 }
  0xc7   :  { %221 = vst [vmem:[#allocation2 + $0x70] sm:$0xff] %v196_v47  ;;  %v157_v58 = vpop.f32.mrf.mxu1 }
  0xc8   :  { %v158_v0 = vadd.f32 %v157_v58, %v760_v57  ;;  %v163_v1 = vpop.f32.mrf.mxu3 }
  0xc9   :  { %v164_v5 = vadd.f32 %v163_v1, %v760_v57  ;;  %v116_v9 = vpop.f32.mrf.mxu0 }
  0xca   :  { %223 = vst [vmem:[#allocation2 + $0x80] sm:$0xff] %v158_v0  ;;  %v117_v14 = vadd.f32 %v116_v9, %v762_v59  ;;  %v1000_v59 = vld [vmem:[%s1122_s3 + $0x150] sm:$0xff]  ;;  %v1035_v0 = vmov 0.0   ;;  %s1037_s3 = smov 0  }
  0xcb   :  { %229 = vst [vmem:[#allocation2 + $0xb0] sm:$0xff] %v164_v5 }
  0xcc   :  { %v198_v13 = vpop.f32.mrf.mxu2  ;;  %222 = vst [vmem:[#allocation2 + $0x78] sm:$0xff] %v117_v14 }
  0xcd   :  { %v199_v18 = vadd.f32 %v198_v13, %v764_v60 }
  0xcf   :  { %224 = vst [vmem:[#allocation2 + $0x88] sm:$0xff] %v199_v18  ;;  %v160_v31 = vpop.f32.mrf.mxu1 }
  0xd0   :  { %v161_v38 = vadd.f32 %v160_v31, %v760_v57 }
  0xd2   :  { %226 = vst [vmem:[#allocation2 + $0x98] sm:$0xff] %v161_v38 }
  0xd4   :  { %v201_v42 = vpop.f32.mrf.mxu2 }
  0xd5   :  { %v202_v43 = vadd.f32 %v201_v42, %v764_v60 }
  0xd7   :  { %227 = vst [vmem:[#allocation2 + $0xa0] sm:$0xff] %v202_v43 }
  0xdc   :  { %v204_v47 = vpop.f32.mrf.mxu2 }
  0xdd   :  { %v205_v58 = vadd.f32 %v204_v47, %v764_v60 }
  0xdf   :  { %230 = vst [vmem:[#allocation2 + $0xb8] sm:$0xff] %v205_v58 }
  0xe0 LB: > { %303 = vmatpush.msra.mxu0 %v1015_v21  ;;  %323 = vmatpush.msra.mxu1 %v1020_v22  ;;  %v1133_v10 = vld [vmem:[#allocation9_spill] sm:$0xff]  ;;  %v1134_v11 = vld [vmem:[#allocation10_spill] sm:$0xff]  ;;  %v1135_v12 = vld [vmem:[#allocation11_spill] sm:$0xff]  ;;  %s428_s4 = sshll.u32 %s505_s3, 3  ;;  %v297_v57 = vperm.slane %v1030_v27, 0  ;;  %v298_v60 = vperm.slane %v1030_v27, 1  ;;  %s505_s3 = sphi %s1037_s3, %s285_s3   ;;  %v501_v0 = vphi %v1035_v0, %v409_v0  }
  0xe1   : > { %343 = vmatpush.msra.mxu2 %v1025_v23  ;;  %v1136_v6 = vld [vmem:[#allocation6_spill] sm:$0xff]  ;;  %v1137_v7 = vld [vmem:[#allocation7_spill] sm:$0xff]  ;;  %v1138_v8 = vld [vmem:[#allocation8_spill] sm:$0xff]  ;;  %s288_s18 = sshra.s32 %s428_s4, 3  ;;  %s410_s22 = scalar_lea.vmem %s1119_s5, %s428_s4 }
  0xe2   : > { %304 = vmatpush.msra.mxu0 %v1000_v59  ;;  %324 = vmatpush.msra.mxu1 %v1005_v19  ;;  %v1139_v2 = vld [vmem:[#allocation3_spill] sm:$0xff]  ;;  %v1140_v3 = vld [vmem:[#allocation4_spill] sm:$0xff]  ;;  %v1141_v4 = vld [vmem:[#allocation5_spill] sm:$0xff]  ;;  %s432_s19 = smul.u32 24, %s288_s18  ;;  %s285_s3 = sadd.s32 1, %s505_s3  }
  0xe3   : > { %344 = vmatpush.msra.mxu2 %v1010_v20  ;;  %p282_p0 = scmp.ge.s32.totalorder %s285_s3, 8  }
  0xe4   : > { %305 = vmatpush.msra.mxu0 %v984_v15  ;;  %325 = vmatpush.msra.mxu1 %v989_v16  ;;  %s1101_s1 = scalar_lea.vmem [#allocation2], %s432_s19 }
  0xe5   : > { %345 = vmatpush.msra.mxu2 %v994_v17 }
  0xe6   : > { %306 = vmatpush.msra.mxu0 %v1133_v10  ;;  %326 = vmatpush.msra.mxu1 %v1134_v11  ;;  %v293_v1 = vld [vmem:[%s1101_s1] sm:$0xff]  ;;  %v294_v9 = vld [vmem:[%s1101_s1 + $0x8] sm:$0xff]  ;;  %v299_v10 = vperm.slane %v1030_v27, 2 }
  0xe7   : > { %346 = vmatpush.msra.mxu2 %v1135_v12 }
  0xe8   : > { %307 = vmatpush.msra.mxu0 %v1136_v6  ;;  %327 = vmatpush.msra.mxu1 %v1137_v7 }
  0xe9   : > { %347 = vmatpush.msra.mxu2 %v1138_v8 }
  0xea   : > { %308 = vmatpush.msra.mxu0 %v1139_v2  ;;  %328 = vmatpush.msra.mxu1 %v1140_v3 }
  0xeb   : > { %348 = vmatpush.msra.mxu2 %v1141_v4 }
  0xec   : > { %309 = vmatpush.msra.mxu0 %v921_v61  ;;  %329 = vmatpush.msra.mxu1 %v926_v62 }
  0xed   : > { %349 = vmatpush.msra.mxu2 %v931_v63 }
  0xee   : > { %310 = vmatpush.msra.mxu0 %v906_v54  ;;  %330 = vmatpush.msra.mxu1 %v911_v55 }
  0xef   : > { %350 = vmatpush.msra.mxu2 %v916_v56 }
  0xf0   : > { %311 = vmatpush.msra.mxu0 %v891_v51  ;;  %331 = vmatpush.msra.mxu1 %v896_v52 }
  0xf1   : > { %351 = vmatpush.msra.mxu2 %v901_v53 }
  0xf2   : > { %312 = vmatpush.msra.mxu0 %v876_v48  ;;  %332 = vmatpush.msra.mxu1 %v881_v49 }
  0xf3   : > { %352 = vmatpush.msra.mxu2 %v886_v50 }
  0xf4   : > { %313 = vmatpush.msra.mxu0 %v860_v44  ;;  %333 = vmatpush.msra.mxu1 %v865_v45 }
  0xf5   : > { %353 = vmatpush.msra.mxu2 %v870_v46 }
  0xf6   : > { %314 = vmatpush.msra.mxu0 %v844_v39  ;;  %334 = vmatpush.msra.mxu1 %v849_v40 }
  0xf7   : > { %354 = vmatpush.msra.mxu2 %v854_v41 }
  0xf8   : > { %315 = vmatpush.msra.mxu0 %v829_v35  ;;  %335 = vmatpush.msra.mxu1 %v834_v36 }
  0xf9   : > { %355 = vmatpush.msra.mxu2 %v839_v37 }
  0xfa   : > { %316 = vmatpush.msra.mxu0 %v814_v32  ;;  %336 = vmatpush.msra.mxu1 %v819_v33 }
  0xfb   : > { %356 = vmatpush.msra.mxu2 %v824_v34 }
  0xfc   : > { %317 = vmatpush.msra.mxu0 %v798_v28  ;;  %337 = vmatpush.msra.mxu1 %v803_v29 }
  0xfd   : > { %357 = vmatpush.msra.mxu2 %v808_v30 }
  0xfe   : > { %318 = vmatpush.msra.mxu0 %v783_v24  ;;  %338 = vmatpush.msra.mxu1 %v788_v25 }
  0xff   : > { %319 = vmatmul.f32.vlgmr.msra.gmra.mxu0 %v501_v0  ;;  %339 = vmatmul.f32.vlgmr.msra.gmra.mxu1 %v501_v0 }
 0x100   : > { %358 = vmatpush.msra.mxu2 %v793_v26 }
 0x101   : > { %359 = vmatmul.f32.vlgmr.msra.gmra.mxu2 %v501_v0 }
 0x17c   : > { %v320_v5 = vpop.f32.mrf.mxu0  ;;  %v340_v13 = vpop.f32.mrf.mxu1 }
 0x17d   : > { %v321_v14 = vadd.f32 %v320_v5, %v297_v57  ;;  %v341_v18 = vadd.f32 %v340_v13, %v298_v60 }
 0x17f   : > { %v363_v31 = vadd.f32 %v321_v14, %v293_v1  ;;  %v383_v38 = vadd.f32 %v341_v18, %v294_v9 }
 0x181   : > { %v430_v42 = vmul.f32 -1.442695, %v363_v31  ;;  %v431_v43 = vmul.f32 -1.442695, %v383_v38 }
 0x183   : > { %481 = vpow2.f32 %v430_v42 }
 0x184   : > { %483 = vpow2.f32 %v431_v43  ;;  %v360_v1 = vpop.f32.mrf.mxu2  ;;  %v295_v43 = vld [vmem:[%s1101_s1 + $0x10] sm:$0xff] }
 0x185   : > { %v361_v18 = vadd.f32 %v360_v1, %v299_v10 }
 0x189   : > { %v482_v47 = vpop.eup %481 }
 0x18a   : > { %v484_v58 = vpop.eup %483  ;;  %v367_v2 = vadd.f32 1.0, %v482_v47 }
 0x18b   : > { %v387_v3 = vadd.f32 1.0, %v484_v58 }
 0x18c   : > { %485 = vrcp.f32 %v367_v2  ;;  %v379_v5 = vand.u32 2147483648, %v367_v2  ;;  %v377_v13 = vand.u32 2147483647, %v367_v2  ;;  %vm373_vm1 = vweird.f32 %v367_v2 }
 0x18d   : > { %487 = vrcp.f32 %v387_v3  ;;  %vm393_vm4 = vweird.f32 %v387_v3  ;;  %v397_v11 = vand.u32 2147483647, %v387_v3 }
 0x18e   : > { %v380_v38 = vor.u32 1.1754944e-38, %v379_v5  ;;  %vm378_vm3 = vcmp.eq.f32.partialorder %v377_v13, 8.507059e+37 }
 0x18f   : > { %vm398_vm7 = vcmp.eq.f32.partialorder %v397_v11, 8.507059e+37 }
 0x192   : > { %v486_v4 = vpop.eup %485 }
 0x193   : > { %v488_v6 = vpop.eup %487  ;;  %v369_v7 = vmul.f32 %v486_v4, %v367_v2  ;;  %vm374_vm0 = vweird.f32 %v486_v4 }
 0x194   : > { %v389_v8 = vmul.f32 %v488_v6, %v387_v3  ;;  %vm375_vm2 = vmor %vm373_vm1, %vm374_vm0  ;;  %vm394_vm5 = vweird.f32 %v488_v6 }
 0x195   : > { %v370_v57 = vsub.f32 1.0, %v369_v7  ;;  %vm395_vm6 = vmor %vm393_vm4, %vm394_vm5 }
 0x196   : > { %v390_v60 = vsub.f32 1.0, %v389_v8  ;;  %v399_v8 = vand.u32 2147483648, %v387_v3 }
 0x197   : > { %v371_v9 = vmul.f32 %v486_v4, %v370_v57 }
 0x198   : > { %v391_v14 = vmul.f32 %v488_v6, %v390_v60  ;;  %v400_v60 = vor.u32 1.1754944e-38, %v399_v8 }
 0x199   : > { %v372_v31 = vadd.f32 %v486_v4, %v371_v9 }
 0x19a   : > { %v392_v7 = vadd.f32 %v488_v6, %v391_v14 }
 0x19b   : > { %v376_v42 = vsel %vm375_vm2, %v486_v4, %v372_v31 }
 0x19c   : > { %v381_v47 = vsel %vm378_vm3, %v380_v38, %v376_v42  ;;  %v396_v12 = vsel %vm395_vm6, %v488_v6, %v392_v7 }
 0x19d   : > { %v403_v58 = vmul.f32 %v381_v47, %v361_v18  ;;  %v401_v2 = vsel %vm398_vm7, %v400_v60, %v396_v12 }
 0x19e   : > { %v406_v10 = vsub.f32 1.0, %v401_v2  ;;  %v408_v5 = vmul.f32 %v501_v0, %v401_v2 }
 0x19f   : > { %v404_v57 = vadd.f32 %v403_v58, %v295_v43 }
 0x1a1   : > { %489 = vtanh.f32 %v404_v57 }
 0x1a7   : > { %v490_v1 = vpop.eup %489 }
 0x1a8   : > { %v407_v4 = vmul.f32 %v490_v1, %v406_v10  ;;  %284 = sbr.rel (!%p282_p0) target bundleno = 224 (0xe0), region = 49 }
 0x1aa   : > { %v409_v0 = vadd.f32 %v408_v5, %v407_v4  }
 0x1ac   : > { %411 = vst [vmem:[%s410_s22] sm:$0xff] %v409_v0 }

</bundles_post_ra>
